<compile_context>
chip_gen: v5e
topology: v5e:2x2
jax: 0.10.0
libtpu: 0.0.40
codegen_flags: <defaults>
</compile_context>

<pallas_src>
import itertools
import math

import jax
import jax.numpy as jnp
import numpy as np
from jax.experimental import pallas as pl
from jax.experimental.pallas import tpu as pltpu


# ----------------------- configuration (update_layer args) -----------------------
IN_FEATURES = 32
OUT_FEATURES = 64
BATCH = 8
R = 4                                   # number of diagonal blocks
COMPOUND_PATTERN = ("comp_1", "comp_2")
COMPOUND_TYPE = "comp"
BLOCK_SHARE = False
USE_ORTHOGONAL = True
NUM_ADAPTERS = 2
ADAPTER_MULTIPLICATIVE = True
MODULE_DROPOUT = 0.0                    # eval mode -> adapter always applied

LANE = 128                              # TPU lane width (pad OUT to this)
SUBLANE = 8                             # f32 sublane multiple for batch rows
MAX_BATCH_TILE = 2048                   # ~2.6 MB/tile VMEM; safe on v5e/v6e/v7x


def _round_up(x, m):
    return ((x + m - 1) // m) * m


# ----------------------- CompoundLayer helper math (plain JAX glue) ---------------
def find_closest_binomial(target, compound_pattern):
    binom_map = {
        "comp_1": lambda x: x,
        "comp_2": lambda x: math.comb(x, 2),
        "comp_3": lambda x: math.comb(x, 3),
    }
    n = 2
    prev = 1
    while True:
        v = sum(binom_map[p](n) for p in compound_pattern if p in binom_map)
        if v > target:
            return n - 1, prev
        prev = v
        n += 1


def cayley_batch(data):
    # data: (b, n, n) -> Q = (I - skew) @ inv(I + skew)
    b, r, c = data.shape
    skew = 0.5 * (data - jnp.swapaxes(data, 1, 2))
    eye = jnp.broadcast_to(jnp.eye(r, dtype=data.dtype), (b, r, c))
    return jnp.matmul(eye - skew, jnp.linalg.inv(eye + skew))


def compound_order2(U, compound_type):
    # Mirrors _compute_circuit_compound_(unary, order=2, compound_type).
    n = U.shape[-1]
    pairs = np.array(list(itertools.combinations(range(n), 2)), dtype=np.int32)  # (m, 2)
    sub = U[pairs]                      # (m, 2, n)
    sub = sub[:, :, pairs]              # (m, 2, m, 2)
    sub = jnp.swapaxes(sub, 1, 2)       # (m, m, 2, 2)
    sub = jnp.swapaxes(sub, 2, 3)       # matches .transpose(2, 3)
    if compound_type == "comp":
        return jnp.linalg.det(sub)
    elif compound_type == "max":
        return jnp.max(sub, axis=(-2, -1))
    elif compound_type == "avg":
        return jnp.mean(sub, axis=(-2, -1))
    else:
        # TODO(synk): 'perm' (matrix permanent) compound_type not implemented.
        raise ValueError(f"Unsupported compound_type: {compound_type}")


def _block_diag_pad(sub_blocks, block_size):
    block = jax.scipy.linalg.block_diag(*sub_blocks)
    rb = block.shape[0]
    if rb != block_size:
        padded = jnp.zeros((block_size, block_size), block.dtype)
        padded = padded.at[:rb, :rb].set(block)
        padded = padded.at[rb:, rb:].set(jnp.eye(block_size - rb, dtype=block.dtype))
        block = padded
    return block


def block_diagonal(orth_rotate, compound_pattern, compound_type, r, out_dim):
    block_size = out_dim // r
    blocks = []
    for i in range(r):
        U = orth_rotate[0] if orth_rotate.shape[0] == 1 else orth_rotate[i]
        sub_blocks = []
        for pattern in compound_pattern:
            if pattern == "comp_1":
                sub_blocks.append(U)
            elif pattern == "comp_2":
                sub_blocks.append(compound_order2(U, compound_type))
            # TODO(synk): comp_3 (order-3 compound) not needed for this pattern.
        blocks.append(_block_diag_pad(sub_blocks, block_size))
    return jax.scipy.linalg.block_diag(*blocks)


def get_delta_weight(compound_param):
    # compound_param: (NUM_ADAPTERS, r_or_1, n, n)
    weight = None
    for i in range(NUM_ADAPTERS):
        comp = compound_param[i]
        orth = cayley_batch(comp) if USE_ORTHOGONAL else comp
        w_i = block_diagonal(orth, COMPOUND_PATTERN, COMPOUND_TYPE, R, OUT_FEATURES)
        if weight is None:
            weight = w_i
        elif ADAPTER_MULTIPLICATIVE:
            weight = jnp.matmul(weight, w_i)
        else:
            weight = weight + w_i
    return weight


# ------------------- parameter glue: fused, lane-padded weights -------------------
def prepare_fused_params(w, b, delta_weight, *, mxu_dtype=jnp.bfloat16):
    """Build W_fused = W^T @ delta_weight once (static weights), zero-pad the
    OUT dimension to a multiple of 128 lanes, and cast MXU operand to bf16.
    Bias stays f32 (epilogue is done in f32; v5e has no bf16 VPU path)."""
    out_features, in_features = w.shape
    out_p = _round_up(out_features, LANE)
    wf = jnp.matmul(w.T.astype(jnp.float32), delta_weight.astype(jnp.float32))  # (IN, OUT)
    wf_p = jnp.zeros((in_features, out_p), jnp.float32).at[:, :out_features].set(wf)
    b_p = jnp.zeros((1, out_p), jnp.float32).at[:, :out_features].set(
        b.astype(jnp.float32))
    return wf_p.astype(mxu_dtype), b_p


# ----------------------------- batch tiling policy --------------------------------
def _choose_batch_tiling(batch, max_tile=MAX_BATCH_TILE):
    """Pick (b_pad, tb) such that:
       * b_pad is the batch rounded up to the f32 sublane multiple (8) only
         (no over-padding by up to a full tile),
       * tb is the largest multiple of 8 <= max_tile that divides b_pad exactly,
       * on v7x-sized workloads the grid has >= 2 steps so the "parallel" batch
         axis shards across both TensorCores."""
    b_pad = _round_up(batch, SUBLANE)
    tb = min(b_pad, max_tile)
    while b_pad % tb:
        tb -= SUBLANE
    # Enough work for >1 tile but only one grid step? split in half for v7x's
    # two TensorCores (costs one ~0.35us extra step on 1-TC chips; negligible).
    if b_pad // tb == 1 and b_pad >= 512 and b_pad % (2 * SUBLANE) == 0:
        tb = b_pad // 2
    return b_pad, tb


# ----------------------------- Pallas kernel (hot path) ---------------------------
def compound_fused_kernel(x_ref, wf_ref, b_ref, o_ref):
    # Single fused matmul on the MXU: out = x @ (W^T @ delta) + b.
    # x arrives in f32 and is cast to bf16 in-register (VPU cast, hidden under
    # the memory stall); f32 accumulation; f32 bias add; lane-dense 128 store.
    acc = jnp.dot(x_ref[...].astype(jnp.bfloat16), wf_ref[...],
                  preferred_element_type=jnp.float32)
    o_ref[...] = (acc + b_ref[...]).astype(o_ref.dtype)


def compound_forward(x, wf_p, b_p, out_features):
    # x: (B, IN) f32   wf_p: (IN, OUT_P) bf16   b_p: (1, OUT_P) f32
    batch, in_features = x.shape
    out_p = wf_p.shape[1]
    w_itemsize = jnp.dtype(wf_p.dtype).itemsize

    b_pad, tb = _choose_batch_tiling(batch)
    if b_pad != batch:
        x = jnp.zeros((b_pad, in_features), x.dtype).at[:batch].set(x)

    cost = pl.CostEstimate(
        flops=2 * b_pad * in_features * out_p,
        transcendentals=0,
        bytes_accessed=(b_pad * in_features * 4                # x (f32, cast in-kernel)
                        + in_features * out_p * w_itemsize     # fused weight (bf16)
                        + out_p * 4                            # bias (f32)
                        + b_pad * out_p * 4),                  # output (f32)
    )

    out = pl.pallas_call(
        compound_fused_kernel,
        # NOTE: switch to bf16 here if the consumer tolerates it -- halves the
        # dominant HBM writeback stream. f32 kept for module dtype parity.
        out_shape=jax.ShapeDtypeStruct((b_pad, out_p), jnp.float32),
        grid_spec=pltpu.PrefetchScalarGridSpec(
            num_scalar_prefetch=0,
            grid=(b_pad // tb,),
            in_specs=[
                pl.BlockSpec((tb, in_features), lambda i: (i, 0)),     # x tile (f32)
                pl.BlockSpec((in_features, out_p), lambda i: (0, 0)),  # weight (resident)
                pl.BlockSpec((1, out_p), lambda i: (0, 0)),            # bias (resident)
            ],
            out_specs=pl.BlockSpec((tb, out_p), lambda i: (i, 0)),
        ),
        compiler_params=pltpu.CompilerParams(
            dimension_semantics=("parallel",),
        ),
        cost_estimate=cost,
    )(x, wf_p, b_p)

    # Slice away padded rows/lanes for the reference comparison. If the next op
    # can consume the padded (b_pad, 128) slab directly, skip this pass.
    return out[:batch, :out_features]


# -------------------------------------- main ---------------------------------------
if __name__ == "__main__":
    key = jax.random.PRNGKey(0)
    k_x, k_w, k_b, k_c = jax.random.split(key, 4)

    # n for the compound blocks: binom(n,1)+binom(n,2) <= out/r
    compound_n, _ = find_closest_binomial(OUT_FEATURES // R, COMPOUND_PATTERN)

    # Deterministic parameter init (xavier_uniform-style for the compound param).
    x = jax.random.normal(k_x, (BATCH, IN_FEATURES), jnp.float32)
    w = jax.random.normal(k_w, (OUT_FEATURES, IN_FEATURES), jnp.float32) * 0.05
    b = jax.random.normal(k_b, (OUT_FEATURES,), jnp.float32) * 0.1

    comp_rows = 1 if BLOCK_SHARE else R
    fan_in = comp_rows * compound_n * compound_n
    fan_out = NUM_ADAPTERS * compound_n * compound_n
    bound = math.sqrt(6.0 / (fan_in + fan_out))
    compound_param = jax.random.uniform(
        k_c, (NUM_ADAPTERS, comp_rows, compound_n, compound_n),
        jnp.float32, minval=-bound, maxval=bound)

    # Static parameter glue (done once, outside the per-call path).
    delta_weight = get_delta_weight(compound_param)              # (OUT, OUT)
    wf_p, b_p = prepare_fused_params(w, b, delta_weight)         # (IN, 128) bf16, (1, 128) f32
    wf_p = jax.block_until_ready(wf_p)

    # jit the call path so the (rare) row pad fuses around the pallas_call.
    fwd = jax.jit(lambda xx: compound_forward(xx, wf_p, b_p, OUT_FEATURES))

    out = fwd(x)
    out = jax.block_until_ready(out)

    # Reference 1: same bf16 MXU-operand math in plain JAX (tight tolerance).
    ref_bf16 = (jnp.dot(x.astype(jnp.bfloat16), wf_p,
                        preferred_element_type=jnp.float32)[:, :OUT_FEATURES] + b)
    np.testing.assert_allclose(np.asarray(out), np.asarray(ref_bf16),
                               rtol=1e-3, atol=1e-3)

    # Reference 2: original module forward sequence in full f32
    # (bf16 operand cast + algebraic fusion stay within loose tolerance).
    base = x @ w.T + b
    ref_module = (base - b) @ delta_weight + b
    np.testing.assert_allclose(np.asarray(out), np.asarray(ref_module),
                               rtol=5e-2, atol=5e-2)

    print("KERNEL_OK")
</pallas_src>

<mosaic_0001>
module attributes {stable_mosaic.version = 11 : i64} {
  func.func @compound_fused_kernel(%arg0: i32, %arg1: memref<8x32xf32, #tpu.memory_space<vmem>>, %arg2: memref<32x128xbf16, #tpu.memory_space<vmem>>, %arg3: memref<1x128xf32, #tpu.memory_space<vmem>>, %arg4: memref<8x128xf32, #tpu.memory_space<vmem>>) attributes {dimension_semantics = [#tpu.dimension_semantics<parallel>], iteration_bounds = array<i64: 1>, scalar_prefetch = 0 : i64, scratch_operands = 0 : i64, tpu.core_type = #tpu.core_type<tc>, window_params = [{transform_indices = @transform_0, window_bounds = array<i64: 8, 32>}, {pipeline_mode = #tpu.pipeline_mode<synchronous>, transform_indices = @transform_1, window_bounds = array<i64: 32, 128>}, {pipeline_mode = #tpu.pipeline_mode<synchronous>, transform_indices = @transform_2, window_bounds = array<i64: 1, 128>}, {transform_indices = @transform_3, window_bounds = array<i64: 8, 128>}]} {
    %c0 = arith.constant 0 : index
    %c0_0 = arith.constant 0 : index
    %0 = vector.load %arg1[%c0, %c0_0] : memref<8x32xf32, #tpu.memory_space<vmem>>, vector<8x32xf32>
    %1 = arith.truncf %0 : vector<8x32xf32> to vector<8x32xbf16>
    %c0_1 = arith.constant 0 : index
    %c0_2 = arith.constant 0 : index
    %2 = vector.load %arg2[%c0_1, %c0_2] : memref<32x128xbf16, #tpu.memory_space<vmem>>, vector<32x128xbf16>
    %cst = arith.constant dense<0.000000e+00> : vector<8x128xf32>
    %3 = tpu.matmul %1, %2, %cst {dimension_numbers = #tpu.dot_dimension_numbers<[1], [0], [0], [1], [0, 0, 1, 1], [], []>} : vector<8x32xbf16>, vector<32x128xbf16>, vector<8x128xf32> -> vector<8x128xf32>
    %c0_3 = arith.constant 0 : index
    %c0_4 = arith.constant 0 : index
    %4 = vector.load %arg3[%c0_3, %c0_4] : memref<1x128xf32, #tpu.memory_space<vmem>>, vector<1x128xf32>
    %5 = vector.broadcast %4 : vector<1x128xf32> to vector<8x128xf32>
    %6 = arith.addf %3, %5 : vector<8x128xf32>
    %c0_5 = arith.constant 0 : index
    %c0_6 = arith.constant 0 : index
    %7 = vector.load %arg4[%c0_5, %c0_6] : memref<8x128xf32, #tpu.memory_space<vmem>>, vector<8x128xf32>
    tpu.vector_store %arg4[%c0_5, %c0_6], %6 {strides = array<i32>} : memref<8x128xf32, #tpu.memory_space<vmem>>, vector<8x128xf32>,
    return
  }
  func.func @transform_0(%arg0: i32) -> (i32, i32) {
    %c0_i32 = arith.constant 0 : i32
    %c0_i32_0 = arith.constant 0 : i32
    return %arg0, %c0_i32 : i32, i32
  }
  func.func @transform_1(%arg0: i32) -> (i32, i32) {
    %c0_i32 = arith.constant 0 : i32
    %c0_i32_0 = arith.constant 0 : i32
    %c0_i32_1 = arith.constant 0 : i32
    return %c0_i32, %c0_i32_0 : i32, i32
  }
  func.func @transform_2(%arg0: i32) -> (i32, i32) {
    %c0_i32 = arith.constant 0 : i32
    %c0_i32_0 = arith.constant 0 : i32
    %c0_i32_1 = arith.constant 0 : i32
    return %c0_i32, %c0_i32_0 : i32, i32
  }
  func.func @transform_3(%arg0: i32) -> (i32, i32) {
    %c0_i32 = arith.constant 0 : i32
    %c0_i32_0 = arith.constant 0 : i32
    return %arg0, %c0_i32 : i32, i32
  }
}

</mosaic_0001>

<bundles_post_ra>
// kernel: _lambda_.1
= control target key start
LH: loop header
LB: loop body
LE: loop exit
PB: predicated region body
PF: predicated region fallthrough
CT: control target
= control target key end

     0   :  { %8 = vsyncpa [#allocation3], 0  ;;  %s236_s0 = inlined_call_operand.hbm [shape: f32[8,32], index: 0, kind: input, shape index: {}]   ;;  %s237_s1 = inlined_call_operand.hbm [shape: bf16[32,128], index: 1, kind: input, shape index: {}]   ;;  %s238_s2 = inlined_call_operand.vmem [shape: f32[1,128], index: 2, kind: input, shape index: {}]   ;;  %s239_s3 = inlined_call_operand.hbm [shape: f32[8,128], index: 3, kind: output, shape index: {}]  }
   0x1   :  { %9 = vsyncpa [#allocation6], 0 }
   0x2   :  { %10 = vsyncpa [#allocation4], 0  ;;  %s16_s14 = sshll.u32 %s236_s0, 4  ;;  %s199_s15 = smov [#allocation2]   ;;  %s17_s14 = int_to_ptr.hbm [resolvable:$true] %s16_s14 }
   0x3   :  { %s18_s16 = sshll.u32 %s199_s15, 4  ;;  %s26_s19 = sshll.u32 %s237_s1, 4  ;;  %s19_s16 = int_to_ptr.vmem [resolvable:$true] %s18_s16  ;;  %s27_s19 = int_to_ptr.hbm [resolvable:$true] %s26_s19 }
   0x4   :  { %21 = dma.hbm_to_vmem [thread:$0]  %s17_s14, 128, %s19_s16, [#allocation3]  }
   0x5   :  { %s200_s20 = smov [#allocation5]   ;;  %s201_s22 = smov 64  }
   0x6   :  { %s28_s21 = sshll.u32 %s200_s20, 4  ;;  %s202_s23 = smov 4   ;;  %s29_s21 = int_to_ptr.vmem [resolvable:$true] %s28_s21 }
   0x7   :  { %34 = dma.hbm_to_vmem [thread:$0]  %s27_s19, 256, %s29_s21, [#allocation6], %s201_s22, %s201_s22, %s202_s23  }
   0x8   :  { %193 = dma.done.wait [#allocation3], 128  }
   0x9   :  { %194 = vsyncadd [#allocation3], 4294967168 }
   0xa   :  { %195 = dma.done.wait [#allocation6], 256  }
   0xb   :  { %196 = vsyncadd [#allocation6], 4294967040  ;;  %v114_v0 = vld [vmem:[#allocation5 + $0x8] sm:$0xff]  ;;  %v113_v1 = vld [vmem:[#allocation5] sm:$0xff]  ;;  %vm68_vm0 = vcmask 261120   ;;  %s203_s24 = smov [#allocation7]  }
   0xc   :  { %78 = vmatpush.bf16.msra.mxu0 %v114_v0  ;;  %v46_v2 = vld [vmem:[#allocation2] sm:$0xff]  ;;  %s91_s25 = sshll.u32 %s203_s24, 4  ;;  %s93_s28 = sshll.u32 %s239_s3, 4  ;;  %s92_s25 = int_to_ptr.vmem [resolvable:$true] %s91_s25  ;;  %s94_s28 = int_to_ptr.hbm [resolvable:$true] %s93_s28 }
   0xd   :  { %v47_v3 = vpack.c.bf16 %v46_v2, %v46_v2  ;;  %v120_v4 = vld [vmem:[%s238_s2] ss:$0 sm:$0xff] }
  0x10   :  { %79 = vmatpush.bf16.msra.mxu0 %v113_v1 }
  0x13   :  { %112 = vmatmul.msk.bf16.vlgmr.msra.gmra.mxu0 %vm68_vm0, %v47_v3 }
  0x90   :  { %v81_v5 = vpop.f32.mrf.mxu0 }
  0x91   :  { %v82_v6 = vadd.f32 %v120_v4, %v81_v5 }
  0x93   :  { %85 = vst [vmem:[#allocation7] sm:$0xff] %v82_v6 }
  0x94   :  { %96 = dma.vmem_to_hbm [thread:$0]  %s92_s25, 128, %s94_s28, [#allocation4]  }
  0x98   :  { %v83_v7 = vpop.f32.mrf.mxu0 }
  0x99   :  { %197 = dma.done.wait [#allocation4], 128  }
  0x9a   :  { %198 = vsyncadd [#allocation4], 4294967168 }
  0x9b   :  { %101 = vsyncpa [#allocation3], 1 }
  0x9c   :  { %102 = vsyncpa [#allocation6], 1 }
  0x9d   :  { %103 = vsyncpa [#allocation4], 1 }

</bundles_post_ra>
